<compile_context>
chip_gen: v7x
topology: tpu7x:2x2x1
jax: 0.10.0
libtpu: 0.0.40
codegen_flags: <defaults>
</compile_context>

<pallas_src>
import jax
import jax.numpy as jnp
from jax.experimental import pallas as pl
from jax.experimental.pallas import tpu as pltpu

IN_FEATURES = 6 + 6       # 12
HIDDEN = 200
NUM_ACTIONS = 3 + 3       # 6
OUT_PAD = 8               # narrow padded output width (lane dim of the output)
NO_GRID_MAX_ROWS = 64     # batches up to this (rows) use the single-tile path


def actor_kernel(x_ref, w_ref, b_ref, out_ref):
    # Fused eval-mode affine: fc2(drop1(fc1(x))) == x @ (w1@w2) + (b1@w2 + b2)
    # (bt, 12) @ (12, 8) + (1, 8); columns 6..7 of w/b are zero padding.
    o = jnp.dot(x_ref[...], w_ref[...],
                preferred_element_type=jnp.float32) + b_ref[...]
    # drop2: identity (eval mode)

    col = jax.lax.broadcasted_iota(jnp.int32, o.shape, 1)
    g0 = col < 3
    g1 = jnp.logical_and(col >= 3, col < NUM_ACTIONS)
    valid = col < NUM_ACTIONS

    # One shared per-row max over the 6 real logits: softmax is shift-invariant
    # within each group, so subtracting the global max is exact and stable
    # (one XLU reduction instead of two).
    m = jnp.max(jnp.where(valid, o, -jnp.inf), axis=-1, keepdims=True)
    e = jnp.where(valid, jnp.exp(o - m), 0.0)          # padded cols -> 0

    s0 = jnp.sum(jnp.where(g0, e, 0.0), axis=-1, keepdims=True)
    s1 = jnp.sum(jnp.where(g1, e, 0.0), axis=-1, keepdims=True)
    s = jnp.where(g0, s0, jnp.where(g1, s1, 1.0))

    # Exact division (approx reciprocal previously exceeded the 1e-3 tolerance).
    # Padded columns: e == 0, s == 1 -> stored as exact zeros.
    out_ref[...] = e / s


def _round_up(x, m):
    return (x + m - 1) // m * m


def actor_forward(x, w1, b1, w2, b2, block_b=512):
    """Actor forward (eval mode).

    x: (12,) or (B, 12) float32 -> (6,) or (B, 6).
    w1: (12, 200), b1: (200,), w2: (200, 6), b2: (6,)  (input-major layouts).
    block_b: max batch tile rows (multiple of 8 recommended).
    """
    squeeze = (x.ndim == 1)
    xb = jnp.asarray(x, jnp.float32).reshape(-1, IN_FEATURES)
    B = xb.shape[0]

    # --- one-time weight fusion (do at init in a real deployment) ----------
    w1f = jnp.asarray(w1, jnp.float32)
    b1f = jnp.asarray(b1, jnp.float32)
    w2f = jnp.asarray(w2, jnp.float32)
    b2f = jnp.asarray(b2, jnp.float32)
    hp = jax.lax.Precision.HIGHEST
    w_fused = jnp.dot(w1f, w2f, precision=hp)                     # (12, 6)
    b_fused = jnp.dot(b1f, w2f, precision=hp) + b2f               # (6,)
    wp = jnp.pad(w_fused, ((0, 0), (0, OUT_PAD - NUM_ACTIONS)))   # (12, 8)
    bp = jnp.pad(b_fused.reshape(1, NUM_ACTIONS),
                 ((0, 0), (0, OUT_PAD - NUM_ACTIONS)))            # (1, 8)

    # --- tile selection -----------------------------------------------------
    # Tiny batch: one no-grid tile (whole operands in VMEM, no pipeline
    # bookkeeping).  Otherwise: >= 2 grid steps, batch axis "parallel" so both
    # v7x TensorCores get work (v5e/v6e unaffected).
    B8 = _round_up(B, 8)
    if B8 <= min(block_b, NO_GRID_MAX_ROWS):
        bt = B8
    else:
        n_tiles = max(2, pl.cdiv(B8, block_b))
        bt = _round_up(pl.cdiv(B8, n_tiles), 8)
    Bp = _round_up(B8, bt)
    if Bp != B:
        xb = jnp.pad(xb, ((0, Bp - B), (0, 0)))

    out_shape = jax.ShapeDtypeStruct((Bp, OUT_PAD), jnp.float32)

    if Bp == bt:
        out = pl.pallas_call(actor_kernel, out_shape=out_shape)(xb, wp, bp)
    else:
        out = pl.pallas_call(
            actor_kernel,
            out_shape=out_shape,
            grid=(Bp // bt,),
            in_specs=[
                pl.BlockSpec((bt, IN_FEATURES), lambda i: (i, 0)),
                # Fused weight / bias: constant block index -> fetched once and
                # kept resident across the batch grid.
                pl.BlockSpec((IN_FEATURES, OUT_PAD), lambda i: (0, 0)),
                pl.BlockSpec((1, OUT_PAD), lambda i: (0, 0)),
            ],
            out_specs=pl.BlockSpec((bt, OUT_PAD), lambda i: (i, 0)),
            compiler_params=pltpu.CompilerParams(
                dimension_semantics=("parallel",)),
        )(xb, wp, bp)

    out = out[:B, :NUM_ACTIONS]
    return out.reshape(NUM_ACTIONS) if squeeze else out


def _reference(x, w1, b1, w2, b2):
    hp = jax.lax.Precision.HIGHEST
    xb = jnp.asarray(x, jnp.float32).reshape(-1, IN_FEATURES)
    h = jnp.dot(xb, w1, precision=hp) + b1.reshape(1, -1)
    o = jnp.dot(h, w2, precision=hp) + b2.reshape(1, -1)
    p = jnp.concatenate(
        [jax.nn.softmax(o[:, 0:3], axis=-1), jax.nn.softmax(o[:, 3:6], axis=-1)],
        axis=-1)
    return p.reshape(NUM_ACTIONS) if x.ndim == 1 else p


if __name__ == "__main__":
    key = jax.random.PRNGKey(0)
    kx1, kxb, kxg, k1, kb1, k2, kb2 = jax.random.split(key, 7)

    # PyTorch-style uniform init (bound = 1/sqrt(fan_in)), input-major layout.
    bound1 = 1.0 / (IN_FEATURES ** 0.5)
    bound2 = 1.0 / (HIDDEN ** 0.5)
    w1 = jax.random.uniform(k1, (IN_FEATURES, HIDDEN), jnp.float32, -bound1, bound1)
    b1 = jax.random.uniform(kb1, (HIDDEN,), jnp.float32, -bound1, bound1)
    w2 = jax.random.uniform(k2, (HIDDEN, NUM_ACTIONS), jnp.float32, -bound2, bound2)
    b2 = jax.random.uniform(kb2, (NUM_ACTIONS,), jnp.float32, -bound2, bound2)

    # 1) Single feature vector (the torch module's 1-D forward): no-grid path.
    x1 = jax.random.normal(kx1, (IN_FEATURES,), jnp.float32)
    y1 = actor_forward(x1, w1, b1, w2, b2)
    jax.block_until_ready(y1)
    y1_ref = _reference(x1, w1, b1, w2, b2)
    assert y1.shape == (NUM_ACTIONS,)
    err1 = float(jnp.max(jnp.abs(y1 - y1_ref)))
    assert jnp.allclose(y1, y1_ref, atol=1e-3, rtol=1e-3), f"max abs err {err1}"

    # 2) Small batch, small tile -> gridded (parallel batch axis) path:
    #    B=24, bt=8, grid=(3,).
    xb = jax.random.normal(kxb, (24, IN_FEATURES), jnp.float32)
    yb = actor_forward(xb, w1, b1, w2, b2, block_b=8)
    jax.block_until_ready(yb)
    yb_ref = _reference(xb, w1, b1, w2, b2)
    assert yb.shape == (24, NUM_ACTIONS)
    errb = float(jnp.max(jnp.abs(yb - yb_ref)))
    assert jnp.allclose(yb, yb_ref, atol=1e-3, rtol=1e-3), f"max abs err {errb}"

    # 3) Batch above the tiny-batch threshold at the default block_b: the
    #    wrapper splits it into 2 parallel grid steps (both v7x TCs busy).
    xg = jax.random.normal(kxg, (96, IN_FEATURES), jnp.float32)
    yg = actor_forward(xg, w1, b1, w2, b2)
    jax.block_until_ready(yg)
    yg_ref = _reference(xg, w1, b1, w2, b2)
    assert yg.shape == (96, NUM_ACTIONS)
    errg = float(jnp.max(jnp.abs(yg - yg_ref)))
    assert jnp.allclose(yg, yg_ref, atol=1e-3, rtol=1e-3), f"max abs err {errg}"

    print("KERNEL_OK")
</pallas_src>

<mosaic_0001>
module attributes {stable_mosaic.version = 11 : i64} {
  func.func @actor_kernel(%arg0: memref<8x12xf32, #tpu.memory_space<vmem>>, %arg1: memref<12x8xf32, #tpu.memory_space<vmem>>, %arg2: memref<1x8xf32, #tpu.memory_space<vmem>>, %arg3: memref<8x8xf32, #tpu.memory_space<vmem>>) attributes {dimension_semantics = [], scalar_prefetch = 0 : i64, scratch_operands = 0 : i64, tpu.core_type = #tpu.core_type<tc>} {
    %c0 = arith.constant 0 : index
    %c0_0 = arith.constant 0 : index
    %0 = vector.load %arg0[%c0, %c0_0] : memref<8x12xf32, #tpu.memory_space<vmem>>, vector<8x12xf32>
    %c0_1 = arith.constant 0 : index
    %c0_2 = arith.constant 0 : index
    %1 = vector.load %arg1[%c0_1, %c0_2] : memref<12x8xf32, #tpu.memory_space<vmem>>, vector<12x8xf32>
    %cst = arith.constant dense<0.000000e+00> : vector<8x8xf32>
    %2 = tpu.matmul %0, %1, %cst {dimension_numbers = #tpu.dot_dimension_numbers<[1], [0], [0], [1], [0, 0, 1, 1], [], []>} : vector<8x12xf32>, vector<12x8xf32>, vector<8x8xf32> -> vector<8x8xf32>
    %c0_3 = arith.constant 0 : index
    %c0_4 = arith.constant 0 : index
    %3 = vector.load %arg2[%c0_3, %c0_4] : memref<1x8xf32, #tpu.memory_space<vmem>>, vector<1x8xf32>
    %4 = vector.broadcast %3 : vector<1x8xf32> to vector<8x8xf32>
    %5 = arith.addf %2, %4 : vector<8x8xf32>
    %6 = tpu.iota {dimensions = array<i32: 1>} : vector<8x8xi32>
    %c3_i32 = arith.constant 3 : i32
    %7 = vector.broadcast %c3_i32 : i32 to vector<8x8xi32>
    %8 = arith.cmpi slt, %6, %7 : vector<8x8xi32>
    %c3_i32_5 = arith.constant 3 : i32
    %9 = vector.broadcast %c3_i32_5 : i32 to vector<8x8xi32>
    %10 = arith.cmpi sge, %6, %9 : vector<8x8xi32>
    %c6_i32 = arith.constant 6 : i32
    %11 = vector.broadcast %c6_i32 : i32 to vector<8x8xi32>
    %12 = arith.cmpi slt, %6, %11 : vector<8x8xi32>
    %13 = arith.andi %10, %12 : vector<8x8xi1>
    %c6_i32_6 = arith.constant 6 : i32
    %14 = vector.broadcast %c6_i32_6 : i32 to vector<8x8xi32>
    %15 = arith.cmpi slt, %6, %14 : vector<8x8xi32>
    %cst_7 = arith.constant 0xFF800000 : f32
    %16 = vector.broadcast %cst_7 : f32 to vector<8x8xf32>
    %17 = arith.select %15, %5, %16 : vector<8x8xi1>, vector<8x8xf32>
    %cst_8 = arith.constant dense<0xFF800000> : vector<8xf32>
    %18 = vector.multi_reduction <maximumf>, %17, %cst_8 [1] : vector<8x8xf32> to vector<8xf32>
    %19 = vector.shape_cast %18 : vector<8xf32> to vector<8x1xf32>
    %20 = vector.broadcast %19 : vector<8x1xf32> to vector<8x8xf32>
    %21 = arith.subf %5, %20 : vector<8x8xf32>
    %22 = math.exp %21 : vector<8x8xf32>
    %cst_9 = arith.constant 0.000000e+00 : f32
    %23 = vector.broadcast %cst_9 : f32 to vector<8x8xf32>
    %24 = arith.select %15, %22, %23 : vector<8x8xi1>, vector<8x8xf32>
    %cst_10 = arith.constant 0.000000e+00 : f32
    %25 = vector.broadcast %cst_10 : f32 to vector<8x8xf32>
    %26 = arith.select %8, %24, %25 : vector<8x8xi1>, vector<8x8xf32>
    %cst_11 = arith.constant dense<0.000000e+00> : vector<8xf32>
    %27 = vector.multi_reduction <add>, %26, %cst_11 [1] : vector<8x8xf32> to vector<8xf32>
    %28 = vector.shape_cast %27 : vector<8xf32> to vector<8x1xf32>
    %cst_12 = arith.constant 0.000000e+00 : f32
    %29 = vector.broadcast %cst_12 : f32 to vector<8x8xf32>
    %30 = arith.select %13, %24, %29 : vector<8x8xi1>, vector<8x8xf32>
    %cst_13 = arith.constant dense<0.000000e+00> : vector<8xf32>
    %31 = vector.multi_reduction <add>, %30, %cst_13 [1] : vector<8x8xf32> to vector<8xf32>
    %32 = vector.shape_cast %31 : vector<8xf32> to vector<8x1xf32>
    %cst_14 = arith.constant 1.000000e+00 : f32
    %33 = vector.shape_cast %32 : vector<8x1xf32> to vector<8x1xf32>
    %34 = vector.broadcast %33 : vector<8x1xf32> to vector<8x8xf32>
    %35 = vector.broadcast %cst_14 : f32 to vector<8x8xf32>
    %36 = arith.select %13, %34, %35 : vector<8x8xi1>, vector<8x8xf32>
    %37 = vector.shape_cast %28 : vector<8x1xf32> to vector<8x1xf32>
    %38 = vector.broadcast %37 : vector<8x1xf32> to vector<8x8xf32>
    %39 = arith.select %8, %38, %36 : vector<8x8xi1>, vector<8x8xf32>
    %40 = arith.divf %24, %39 : vector<8x8xf32>
    %c0_15 = arith.constant 0 : index
    %c0_16 = arith.constant 0 : index
    %41 = vector.load %arg3[%c0_15, %c0_16] : memref<8x8xf32, #tpu.memory_space<vmem>>, vector<8x8xf32>
    tpu.vector_store %arg3[%c0_15, %c0_16], %40 {strides = array<i32>} : memref<8x8xf32, #tpu.memory_space<vmem>>, vector<8x8xf32>,
    return
  }
}

</mosaic_0001>

<bundles_post_ra>
// kernel: tpu_custom_call.1
= control target key start
LH: loop header
LB: loop body
LE: loop exit
PB: predicated region body
PF: predicated region fallthrough
CT: control target
= control target key end

     0   :  { %vm29_vm0 = vcmask 1043456   ;;  %v195_v2 = vmov 0.0|0.0   ;;  %vm196_vm1 = vmmov 1   ;;  %vm197_vm3 = vmmov 0   ;;  %s248_s0 = inlined_call_operand.vmem [shape: f32[8,12], index: 0, kind: input, shape index: {}]   ;;  %s249_s1 = inlined_call_operand.vmem [shape: f32[12,8], index: 1, kind: input, shape index: {}]   ;;  %s250_s2 = inlined_call_operand.vmem [shape: f32[1,8], index: 2, kind: input, shape index: {}]   ;;  %s251_s3 = inlined_call_operand.hbm [shape: f32[8,8], index: 3, kind: output, shape index: {}]  }
   0x1   :  { %v16_v0 = vld [vmem:[%s249_s1] sm:$0xff]  ;;  %v17_v1 = vld [vmem:[%s249_s1 + $0x8] sm:$0xf]  ;;  %158 = vmatprep.subr.bf16.mxu0 %v195_v2  ;;  %vm160_vm2 = vmpackc.low %vm29_vm0, %vm196_vm1  ;;  %v198_v4 = vmov 0.0  }
   0x2   :  { %v159_v3 = vpack.c.bf16 %v17_v1, %v16_v0  ;;  %155 = vmatprep.mubr.msk.f32.mxu0 %vm197_vm3, %v198_v4 }
   0x3   :  { %8 = vsyncpa [#allocation3], 0  ;;  %v15_v5 = vld [vmem:[%s248_s0] sm:$0xff]  ;;  %vm25_vm4 = vcmask 97280   ;;  %v103_v6 = vlaneseq  ;;  %vm110_vm6 = vcmask 64512   ;;  %s199_s0 = smov [#allocation2]  }
   0x4   :  { %161 = vmatpush3.bf16.msk.msra.mxu0 %vm160_vm2, %v159_v3  ;;  %v145_v8 = vld [vmem:[%s250_s2] ss:$0 sm:$0xff]  ;;  %s137_s2 = sshll.u32 %s199_s0, 4  ;;  %s138_s2 = int_to_ptr.vmem [resolvable:$true] %s137_s2 }
   0x5   :  { %v104_v7 = vand.u32 127, %v103_v6  ;;  %s171_s19 = scalar_lea.vmem %s138_s2, 128  ;;  %p176_p1 = scmp.lt.s32.totalorder %s138_s2, %s138_s2 }
   0x6   :  { %p172_p0 = scmp.ne.s32.totalorder %s138_s2, %s171_s19  ;;  %p177_p2 = scmp.lt.s32.totalorder %s171_s19, %s171_s19 }
   0x7   :  { %156 = vmatmul.mubr.msk.f32.vlgmr.msra.gmra.mrb[0].mxu0 %vm25_vm4, %v15_v5  ;;  %vm107_vm5 = vcmp.lt.s32.totalorder %v104_v7, 6  ;;  %vm106_vm7 = vcmp.ge.s32.totalorder %v104_v7, 3  ;;  %vm105_vm9 = vcmp.lt.s32.totalorder %v104_v7, 3 }
   0x8   :  { %vm108_vm8 = vmand %vm106_vm7, %vm107_vm5  ;;  %p178_p3 = por %p177_p2, %p176_p1 }
   0xa   :  { %p179_p4 = pnand %p178_p3, %p172_p0 }
  0xda   :  { %v99_v9 = vpop.f32.mrb[0].mxu0 }
  0xdb   :  { %v100_v10 = vadd.f32 %v145_v8, %v99_v9  ;;  %v157_v11 = vpop.f32.mrb[1].mxu0 }
  0xdd   :  { %v109_v12 = vsel %vm107_vm5, %v100_v10, -inf }
  0xde   :  { %v111_v13 = vsel %vm110_vm6, %v109_v12, -inf }
  0xdf   :  { %112 = vmax.xlane.f32.xlu0 %v111_v13 }
 0x16c   :  { %v113_v14 = vpop.xlane.xlu0 %112 }
 0x16d   :  { %v114_v15 = vsub.f32 %v100_v10, %v113_v14 }
 0x16f   :  { %v115_v16 = vmul.f32 1.442695, %v114_v15 }
 0x171   :  { %167 = vpow2.f32 %v115_v16 }
 0x17b   :  { %v168_v17 = vpop.eup %167 }
 0x17c   :  { %v117_v18 = vsel %vm107_vm5, %v168_v17, 0.0 }
 0x17d   :  { %v122_v19 = vsel %vm108_vm8, %v117_v18, 0.0  ;;  %v118_v20 = vsel %vm105_vm9, %v117_v18, 0.0 }
 0x17e   :  { %v123_v21 = vsel %vm110_vm6, %v122_v19, 0.0  ;;  %v119_v22 = vsel %vm110_vm6, %v118_v20, 0.0 }
 0x17f   :  { %124 = vadd.xlane.f32.xlu0 %v123_v21  ;;  %120 = vadd.xlane.f32.xlu1 %v119_v22 }
 0x20c   :  { %v125_v23 = vpop.xlane.xlu0 %124  ;;  %v121_v24 = vpop.xlane.xlu1 %120 }
 0x20d   :  { %v126_v25 = vsel %vm108_vm8, %v125_v23, 1.0 }
 0x20e   :  { %v127_v26 = vsel %vm105_vm9, %v121_v24, %v126_v25 }
 0x20f   :  { %169 = vrcp.f32 %v127_v26 }
 0x219   :  { %v170_v27 = vpop.eup %169 }
 0x21a   :  { %v129_v28 = vmul.f32 %v170_v27, %v117_v18 }
 0x21c   :  { %130 = vst.msk [vmem:[#allocation2] sm:$0xff] %vm110_vm6, %v129_v28 }
 0x21d   :  { %182 = shalt.err (!%p179_p4)
}
 0x21e   :  { %s183_s22 = scalar_lea.hbm %s251_s3, 128 }
 0x21f   :  { %p184_p5 = scmp.ne.s32.totalorder %s251_s3, %s183_s22  ;;  %p187_p6 = scmp.lt.u32.totalorder %s183_s22, %s251_s3 }
 0x221   :  { %p189_p7 = pnand %p187_p6, %p184_p5 }
 0x223   :  { %192 = shalt.err (!%p189_p7)
}
 0x224   :  { %140 = dma.vmem_to_hbm [thread:$0]  %s138_s2, 128, %s251_s3, [#allocation3]  }
 0x225   :  { %193 = dma.done.wait [#allocation3], 128  }
 0x226   :  { %194 = vsyncadd [#allocation3], 4294967168 }
 0x227   :  { %144 = vsyncpa [#allocation3], 1 }

</bundles_post_ra>
